<compile_context>
chip_gen: v7x
topology: tpu7x:2x2x1
jax: 0.10.0
libtpu: 0.0.40
codegen_flags: <defaults>
</compile_context>

<pallas_src>
import functools

import jax
import jax.numpy as jnp
from jax.experimental import pallas as pl
from jax.experimental.pallas import tpu as pltpu


def _round_up(v, m):
    return (v + m - 1) // m * m


def _vmem_budget():
    """~75% of per-core VMEM capacity, clamped to a sane range."""
    cap = 64 * 1024 * 1024
    try:
        info = pltpu.get_tpu_info()
        cap = int(getattr(info, "vmem_capacity_bytes", cap))
    except Exception:
        pass
    cap = max(64 * 1024 * 1024, min(cap, 128 * 1024 * 1024))
    return int(0.75 * cap)


def _use_bf16_exp():
    """bf16 EUP exists on v6e and later; keep f32 exp on older chips."""
    try:
        kind = jax.devices()[0].device_kind.lower()
    except Exception:
        return False
    return not any(t in kind for t in ("v2", "v3", "v4", "v5"))


def _plan_tiles(B, D, N, O, vmem_budget):
    itm = 2                       # bf16 operands
    O_pad = _round_up(O, 128)
    Daug = D + 2
    N128 = _round_up(N, 128)

    # N tile: keep X^T and W^T fully VMEM-resident across batch tiles when the
    # (double-buffered) slabs fit in ~40% of the budget — their index_map is
    # then constant, so they are DMA'd from HBM exactly once.  Otherwise tile.
    wx_budget = int(0.40 * vmem_budget)
    if 2 * N128 * (Daug + O_pad) * itm <= wx_budget:
        tN = N128
    else:
        tN = 512
        while tN > 128 and 2 * tN * (Daug + O_pad) * itm > wx_budget:
            tN //= 2
        tN = max(tN, 128)
    N_pad = _round_up(N, tN)

    # Batch tile: as large as the acc (f32) + double-buffered out/x slabs
    # allow (amortizes any streamed W^T/X^T HBM traffic), capped at 1024 rows.
    per_row = O_pad * (4 + 2 * itm) + Daug * 2 * itm
    tb_cap = max(8, min(1024, int(0.45 * vmem_budget) // per_row))
    nB = max(1, -(-B // tb_cap))
    if nB == 1 and B >= 128:
        nB = 2            # >=2 'parallel' grid steps keeps both v7x TCs busy
    tB = _round_up(-(-B // nB), 8)
    if tB % 16 and (tB + 8) * nB - B <= max(16, B // 8):
        tB += 8           # bf16-friendly 16-row multiple when padding is cheap
    B_pad = nB * tB
    return tB, tN, O_pad, B_pad, N_pad


def _kerlinear_kernel(xa_ref, xta_ref, wt_ref, b_ref, o_ref, acc_ref, *, bf16_exp):
    """One (batch-tile i, kernel-basis-tile k) grid step.

    xa_ref : (tB, D+2)    augmented x tile  [x/s^2, ||x||^2/(2s^2), 1]   (bf16)
    xta_ref: (D+2, tN)    augmented X^T     [X^T; -1; -||X||^2/(2s^2)]   (bf16)
    wt_ref : (tN, O_pad)  W^T tile                                        (bf16)
    b_ref  : (1, O_pad)   bias                                            (f32)
    o_ref  : (tB, O_pad)  output tile
    acc_ref: (tB, O_pad)  f32 accumulator (bias-initialized at k == 0)
    """
    k = pl.program_id(1)

    @pl.when(k == 0)
    def _():
        acc_ref[...] = jnp.broadcast_to(b_ref[...], acc_ref.shape)

    # Exponent argument straight off the MXU:
    #   arg = x.X/s^2 - ||x||^2/(2s^2) - ||X||^2/(2s^2) = -||x - X||^2/(2s^2)
    arg = jnp.dot(xa_ref[...], xta_ref[...], preferred_element_type=jnp.float32)
    arg = jnp.minimum(arg, 0.0)               # d^2 >= 0 numerical clamp
    if bf16_exp:
        x_image = jnp.exp(arg.astype(jnp.bfloat16))   # bf16 EUP (v6e/v7x)
    else:
        x_image = jnp.exp(arg)

    # Linear-layer partial sum on the MXU, f32 accumulation.
    acc_ref[...] += jnp.dot(x_image.astype(wt_ref.dtype), wt_ref[...],
                            preferred_element_type=jnp.float32)

    @pl.when(k == pl.num_programs(1) - 1)
    def _():
        o_ref[...] = acc_ref[...].astype(o_ref.dtype)


def ker_linear(x, X, weight, bias, sigma, *, tB_override=None, tN_override=None):
    """x: (B, D), X: (N, D), weight: (O, N), bias: (O,) -> (B, O)."""
    B, D = x.shape
    N, _ = X.shape
    O = weight.shape[0]
    out_dtype = x.dtype
    out_itm = jnp.dtype(out_dtype).itemsize

    inv2 = 1.0 / (2.0 * float(sigma) * float(sigma))    # 1 / (2 sigma^2)

    vmem_budget = _vmem_budget()
    tB, tN, O_pad, B_pad, N_pad = _plan_tiles(B, D, N, O, vmem_budget)
    if tN_override is not None:
        tN = tN_override
        N_pad = _round_up(N, tN)
    if tB_override is not None:
        tB = tB_override
        B_pad = _round_up(B, tB)
    Daug = D + 2

    # ---- wrapper-side precompute / layout plumbing (f32 math, bf16 operands) ----
    xf = x.astype(jnp.float32)
    Xf = X.astype(jnp.float32)
    x_sq = jnp.sum(xf * xf, axis=1, keepdims=True) * inv2          # (B, 1)
    X_sq = jnp.sum(Xf * Xf, axis=1, keepdims=True) * inv2          # (N, 1)

    x_aug = jnp.concatenate(
        [xf * (2.0 * inv2), x_sq, jnp.ones((B, 1), jnp.float32)], axis=1)   # (B, D+2)
    Xt_aug = jnp.concatenate(
        [Xf.T, -jnp.ones((1, N), jnp.float32), -X_sq.T], axis=0)            # (D+2, N)

    cdt = jnp.bfloat16
    x_aug = x_aug.astype(cdt)
    Xt_aug = Xt_aug.astype(cdt)
    Wt = weight.T.astype(cdt)                                               # (N, O)
    bias2d = bias.reshape(1, O).astype(jnp.float32)

    # Zero-pad: padded W^T rows nullify any kernel value of padded centers;
    # padded batch rows / output columns are sliced off after the call.
    x_p = jnp.pad(x_aug, ((0, B_pad - B), (0, 0)))
    Xt_p = jnp.pad(Xt_aug, ((0, 0), (0, N_pad - N)))
    Wt_p = jnp.pad(Wt, ((0, N_pad - N), (0, O_pad - O)))
    bias_p = jnp.pad(bias2d, ((0, 0), (0, O_pad - O)))

    grid = (B_pad // tB, N_pad // tN)

    cost = pl.CostEstimate(
        flops=2 * B_pad * N_pad * (Daug + O_pad),
        transcendentals=B_pad * N_pad,
        bytes_accessed=(x_p.size + Xt_p.size + Wt_p.size) * 2
                       + O_pad * 4 + B_pad * O_pad * out_itm,
    )

    kernel = functools.partial(_kerlinear_kernel, bf16_exp=_use_bf16_exp())

    out = pl.pallas_call(
        kernel,
        out_shape=jax.ShapeDtypeStruct((B_pad, O_pad), out_dtype),
        grid_spec=pltpu.PrefetchScalarGridSpec(
            num_scalar_prefetch=0,
            grid=grid,
            in_specs=[
                pl.BlockSpec((tB, Daug), lambda i, k: (i, 0)),      # x_aug tile
                pl.BlockSpec((Daug, tN), lambda i, k: (0, k)),      # X^T_aug tile
                pl.BlockSpec((tN, O_pad), lambda i, k: (k, 0)),     # W^T tile
                pl.BlockSpec((1, O_pad), lambda i, k: (0, 0)),      # bias
            ],
            out_specs=pl.BlockSpec((tB, O_pad), lambda i, k: (i, 0)),
            scratch_shapes=[pltpu.VMEM((tB, O_pad), jnp.float32)],
        ),
        compiler_params=pltpu.CompilerParams(
            dimension_semantics=("parallel", "arbitrary"),
            vmem_limit_bytes=int(vmem_budget),
        ),
        cost_estimate=cost,
    )(x_p, Xt_p, Wt_p, bias_p)

    return out[:B, :O]


def ker_linear_ref(x, X, weight, bias, sigma):
    d2 = jnp.sum((x[:, None, :] - X[None, :, :]) ** 2, axis=-1)
    img = jnp.exp(-d2 / (2.0 * sigma * sigma))
    return img @ weight.T + bias[None, :]


def _make_inputs(key, batch, dim, ker_dim, out_dim):
    kx, kX, kw, kb = jax.random.split(key, 4)
    x = jax.random.normal(kx, (batch, dim), dtype=jnp.float32)
    X = jax.random.normal(kX, (ker_dim, dim), dtype=jnp.float32)
    # torch.nn.Linear(ker_dim, out_dim) default init: U(-1/sqrt(in), 1/sqrt(in))
    bound = 1.0 / (ker_dim ** 0.5)
    weight = jax.random.uniform(kw, (out_dim, ker_dim), jnp.float32, -bound, bound)
    bias = jax.random.uniform(kb, (out_dim,), jnp.float32, -bound, bound)
    return x, X, weight, bias


if __name__ == "__main__":
    key = jax.random.PRNGKey(0)
    k1, k2, k3 = jax.random.split(key, 3)
    # bf16 MXU operands / bf16 exp => loosened tolerances (kernel values in (0,1]).
    ATOL = RTOL = 2e-2

    # Test 1: tiny shapes consistent with the module's forward.
    batch, dim, ker_dim, out_dim, sigma = 8, 32, 16, 8, 1.5
    x, X, weight, bias = _make_inputs(k1, batch, dim, ker_dim, out_dim)
    y = jax.block_until_ready(ker_linear(x, X, weight, bias, sigma))
    y_ref = ker_linear_ref(x, X, weight, bias, sigma)
    assert y.shape == (batch, out_dim)
    assert jnp.allclose(y, y_ref, atol=ATOL, rtol=RTOL)

    # Test 2: larger N (VMEM-resident weights path), small dim so kernel
    # values are O(0.1) and actually exercise the numerics.
    batch, dim, ker_dim, out_dim, sigma = 16, 8, 600, 10, 2.0
    x, X, weight, bias = _make_inputs(k2, batch, dim, ker_dim, out_dim)
    y = jax.block_until_ready(ker_linear(x, X, weight, bias, sigma))
    y_ref = ker_linear_ref(x, X, weight, bias, sigma)
    assert y.shape == (batch, out_dim)
    assert jnp.allclose(y, y_ref, atol=ATOL, rtol=RTOL)

    # Test 3: forced small tiles to exercise the N-axis accumulation loop and
    # multiple batch tiles (grid = (4, 3)).
    batch, dim, ker_dim, out_dim, sigma = 32, 16, 384, 12, 1.8
    x, X, weight, bias = _make_inputs(k3, batch, dim, ker_dim, out_dim)
    y = jax.block_until_ready(
        ker_linear(x, X, weight, bias, sigma, tB_override=8, tN_override=128))
    y_ref = ker_linear_ref(x, X, weight, bias, sigma)
    assert y.shape == (batch, out_dim)
    assert jnp.allclose(y, y_ref, atol=ATOL, rtol=RTOL)

    print("KERNEL_OK")
</pallas_src>

<mosaic_0001>
module attributes {stable_mosaic.version = 11 : i64} {
  func.func @_kerlinear_kernel(%arg0: i32, %arg1: i32, %arg2: memref<16x34xbf16, #tpu.memory_space<vmem>>, %arg3: memref<34x128xbf16, #tpu.memory_space<vmem>>, %arg4: memref<128x128xbf16, #tpu.memory_space<vmem>>, %arg5: memref<1x128xf32, #tpu.memory_space<vmem>>, %arg6: memref<16x128xf32, #tpu.memory_space<vmem>>, %arg7: memref<16x128xf32, #tpu.memory_space<vmem>>) attributes {dimension_semantics = [#tpu.dimension_semantics<parallel>, #tpu.dimension_semantics<arbitrary>], iteration_bounds = array<i64: 1, 1>, scalar_prefetch = 0 : i64, scratch_operands = 1 : i64, tpu.core_type = #tpu.core_type<tc>, window_params = [{transform_indices = @transform_0, window_bounds = array<i64: 16, 34>}, {transform_indices = @transform_1, window_bounds = array<i64: 34, 128>}, {transform_indices = @transform_2, window_bounds = array<i64: 128, 128>}, {pipeline_mode = #tpu.pipeline_mode<synchronous>, transform_indices = @transform_3, window_bounds = array<i64: 1, 128>}, {transform_indices = @transform_4, window_bounds = array<i64: 16, 128>}]} {
    %c0_i32 = arith.constant 0 : i32
    %0 = arith.cmpi eq, %arg1, %c0_i32 : i32
    %1 = arith.extui %0 : i1 to i32
    %c0_i32_0 = arith.constant 0 : i32
    %2 = arith.cmpi ne, %1, %c0_i32_0 : i32
    scf.if %2 {
      %c0_14 = arith.constant 0 : index
      %c0_15 = arith.constant 0 : index
      %18 = vector.load %arg5[%c0_14, %c0_15] : memref<1x128xf32, #tpu.memory_space<vmem>>, vector<1x128xf32>
      %19 = vector.shape_cast %18 : vector<1x128xf32> to vector<1x128xf32>
      %20 = vector.broadcast %19 : vector<1x128xf32> to vector<16x128xf32>
      %c0_16 = arith.constant 0 : index
      %c0_17 = arith.constant 0 : index
      %21 = vector.load %arg7[%c0_16, %c0_17] : memref<16x128xf32, #tpu.memory_space<vmem>>, vector<16x128xf32>
      tpu.vector_store %arg7[%c0_16, %c0_17], %20 {strides = array<i32>} : memref<16x128xf32, #tpu.memory_space<vmem>>, vector<16x128xf32>,
    } else {
    }
    %c0 = arith.constant 0 : index
    %c0_1 = arith.constant 0 : index
    %3 = vector.load %arg2[%c0, %c0_1] : memref<16x34xbf16, #tpu.memory_space<vmem>>, vector<16x34xbf16>
    %c0_2 = arith.constant 0 : index
    %c0_3 = arith.constant 0 : index
    %4 = vector.load %arg3[%c0_2, %c0_3] : memref<34x128xbf16, #tpu.memory_space<vmem>>, vector<34x128xbf16>
    %cst = arith.constant dense<0.000000e+00> : vector<16x128xf32>
    %5 = tpu.matmul %3, %4, %cst {dimension_numbers = #tpu.dot_dimension_numbers<[1], [0], [0], [1], [0, 0, 1, 1], [], []>} : vector<16x34xbf16>, vector<34x128xbf16>, vector<16x128xf32> -> vector<16x128xf32>
    %cst_4 = arith.constant 0.000000e+00 : f32
    %6 = vector.broadcast %cst_4 : f32 to vector<16x128xf32>
    %7 = arith.minimumf %5, %6 : vector<16x128xf32>
    %8 = arith.truncf %7 : vector<16x128xf32> to vector<16x128xbf16>
    %9 = math.exp %8 : vector<16x128xbf16>
    %c0_5 = arith.constant 0 : index
    %c0_6 = arith.constant 0 : index
    %10 = vector.load %arg7[%c0_5, %c0_6] : memref<16x128xf32, #tpu.memory_space<vmem>>, vector<16x128xf32>
    %c0_7 = arith.constant 0 : index
    %c0_8 = arith.constant 0 : index
    %11 = vector.load %arg4[%c0_7, %c0_8] : memref<128x128xbf16, #tpu.memory_space<vmem>>, vector<128x128xbf16>
    %cst_9 = arith.constant dense<0.000000e+00> : vector<16x128xf32>
    %12 = tpu.matmul %9, %11, %cst_9 {dimension_numbers = #tpu.dot_dimension_numbers<[1], [0], [0], [1], [0, 0, 1, 1], [], []>} : vector<16x128xbf16>, vector<128x128xbf16>, vector<16x128xf32> -> vector<16x128xf32>
    %13 = arith.addf %10, %12 : vector<16x128xf32>
    %c0_10 = arith.constant 0 : index
    %c0_11 = arith.constant 0 : index
    %14 = vector.load %arg7[%c0_10, %c0_11] : memref<16x128xf32, #tpu.memory_space<vmem>>, vector<16x128xf32>
    tpu.vector_store %arg7[%c0_10, %c0_11], %13 {strides = array<i32>} : memref<16x128xf32, #tpu.memory_space<vmem>>, vector<16x128xf32>,
    %c0_i32_12 = arith.constant 0 : i32
    %15 = arith.cmpi eq, %arg1, %c0_i32_12 : i32
    %16 = arith.extui %15 : i1 to i32
    %c0_i32_13 = arith.constant 0 : i32
    %17 = arith.cmpi ne, %16, %c0_i32_13 : i32
    scf.if %17 {
      %c0_14 = arith.constant 0 : index
      %c0_15 = arith.constant 0 : index
      %18 = vector.load %arg7[%c0_14, %c0_15] : memref<16x128xf32, #tpu.memory_space<vmem>>, vector<16x128xf32>
      %c0_16 = arith.constant 0 : index
      %c0_17 = arith.constant 0 : index
      %19 = vector.load %arg6[%c0_16, %c0_17] : memref<16x128xf32, #tpu.memory_space<vmem>>, vector<16x128xf32>
      tpu.vector_store %arg6[%c0_16, %c0_17], %18 {strides = array<i32>} : memref<16x128xf32, #tpu.memory_space<vmem>>, vector<16x128xf32>,
    } else {
    }
    return
  }
  func.func @transform_0(%arg0: i32, %arg1: i32) -> (i32, i32) {
    %c0_i32 = arith.constant 0 : i32
    %c0_i32_0 = arith.constant 0 : i32
    return %arg0, %c0_i32 : i32, i32
  }
  func.func @transform_1(%arg0: i32, %arg1: i32) -> (i32, i32) {
    %c0_i32 = arith.constant 0 : i32
    %c0_i32_0 = arith.constant 0 : i32
    return %c0_i32, %arg1 : i32, i32
  }
  func.func @transform_2(%arg0: i32, %arg1: i32) -> (i32, i32) {
    %c0_i32 = arith.constant 0 : i32
    %c0_i32_0 = arith.constant 0 : i32
    return %arg1, %c0_i32 : i32, i32
  }
  func.func @transform_3(%arg0: i32, %arg1: i32) -> (i32, i32) {
    %c0_i32 = arith.constant 0 : i32
    %c0_i32_0 = arith.constant 0 : i32
    %c0_i32_1 = arith.constant 0 : i32
    return %c0_i32, %c0_i32_0 : i32, i32
  }
  func.func @transform_4(%arg0: i32, %arg1: i32) -> (i32, i32) {
    %c0_i32 = arith.constant 0 : i32
    %c0_i32_0 = arith.constant 0 : i32
    return %arg0, %c0_i32 : i32, i32
  }
}

</mosaic_0001>

<bundles_post_ra>
// kernel: tpu_custom_call.1
= control target key start
LH: loop header
LB: loop body
LE: loop exit
PB: predicated region body
PF: predicated region fallthrough
CT: control target
= control target key end

     0   :  { %9 = vsyncpa [#allocation4], 0  ;;  %s568_s0 = inlined_call_operand.hbm [shape: bf16[16,34], index: 0, kind: input, shape index: {}]   ;;  %s569_s1 = inlined_call_operand.hbm [shape: bf16[34,128], index: 1, kind: input, shape index: {}]   ;;  %s570_s2 = inlined_call_operand.hbm [shape: bf16[128,128], index: 2, kind: input, shape index: {}]   ;;  %s571_s3 = inlined_call_operand.vmem [shape: f32[1,128], index: 3, kind: input, shape index: {}]   ;;  %s572_s4 = inlined_call_operand.hbm [shape: f32[16,128], index: 4, kind: output, shape index: {}]  }
   0x1   :  { %10 = vsyncpa [#allocation7], 0 }
   0x2   :  { %11 = vsyncpa [#allocation5], 0  ;;  %s466_s15 = smov [#allocation6]   ;;  %s467_s17 = smov [#allocation3]  }
   0x3   :  { %s29_s16 = sshll.u32 %s466_s15, 4  ;;  %s17_s18 = sshll.u32 %s467_s17, 4  ;;  %s30_s16 = int_to_ptr.vmem [resolvable:$true] %s29_s16  ;;  %s501_s18 = int_to_ptr.vmem [resolvable:$true] %s17_s18 }
   0x4   :  { %s372_s21 = scalar_lea.hbm %s569_s1, 320 }
   0x5   :  { %p373_p0 = scmp.ne.s32.totalorder %s569_s1, %s372_s21  ;;  %p376_p1 = scmp.lt.u32.totalorder %s372_s21, %s569_s1 }
   0x7   :  { %p378_p2 = pnand %p376_p1, %p373_p0 }
   0x9   :  { %381 = shalt.err (!%p378_p2)
}
   0xa   :  { %s382_s26 = scalar_lea.vmem %s30_s16, 320  ;;  %p387_p4 = scmp.lt.s32.totalorder %s30_s16, %s30_s16 }
   0xb   :  { %p383_p3 = scmp.ne.s32.totalorder %s30_s16, %s382_s26  ;;  %p388_p5 = scmp.lt.s32.totalorder %s382_s26, %s382_s26 }
   0xd   :  { %p389_p6 = por %p388_p5, %p387_p4 }
   0xf   :  { %p390_p7 = pnand %p389_p6, %p383_p3 }
  0x11   :  { %393 = shalt.err (!%p390_p7)
}
  0x12   :  { %s468_s27 = smov 64   ;;  %s469_s28 = smov 4  }
  0x13   :  { %35 = dma.hbm_to_vmem [thread:$0]  %s569_s1, 320, %s30_s16, [#allocation7], %s468_s27, %s468_s27, %s469_s28  }
  0x14   :  { %s394_s7 = scalar_lea.hbm %s568_s0, 128 }
  0x15   :  { %p395_p8 = scmp.ne.s32.totalorder %s568_s0, %s394_s7  ;;  %p398_p9 = scmp.lt.u32.totalorder %s394_s7, %s568_s0 }
  0x17   :  { %p400_p10 = pnand %p398_p9, %p395_p8 }
  0x19   :  { %403 = shalt.err (!%p400_p10)
}
  0x1a   :  { %s404_s12 = scalar_lea.vmem %s501_s18, 128  ;;  %p409_p12 = scmp.lt.s32.totalorder %s501_s18, %s501_s18 }
  0x1b   :  { %p405_p11 = scmp.ne.s32.totalorder %s501_s18, %s404_s12  ;;  %p410_p13 = scmp.lt.s32.totalorder %s404_s12, %s404_s12 }
  0x1d   :  { %p411_p0 = por %p410_p13, %p409_p12 }
  0x1f   :  { %p412_p1 = pnand %p411_p0, %p405_p11 }
  0x21   :  { %415 = shalt.err (!%p412_p1)
}
  0x22   :  { %23 = dma.hbm_to_vmem [thread:$0]  %s568_s0, 128, %s501_s18, [#allocation4], %s468_s27, %s468_s27, %s469_s28  }
  0x23   :  { %s470_s14 = smov [#allocation8]   ;;  %s416_s19 = scalar_lea.hbm %s570_s2, 1024 }
  0x24   :  { %s41_s15 = sshll.u32 %s470_s14, 4  ;;  %p417_p2 = scmp.ne.s32.totalorder %s570_s2, %s416_s19  ;;  %s42_s15 = int_to_ptr.vmem [resolvable:$true] %s41_s15 }
  0x25   :  { %p420_p3 = scmp.lt.u32.totalorder %s416_s19, %s570_s2 }
  0x27   :  { %p422_p4 = pnand %p420_p3, %p417_p2 }
  0x29   :  { %425 = shalt.err (!%p422_p4)
}
  0x2a   :  { %s426_s24 = scalar_lea.vmem %s42_s15, 1024  ;;  %p431_p6 = scmp.lt.s32.totalorder %s42_s15, %s42_s15 }
  0x2b   :  { %p427_p5 = scmp.ne.s32.totalorder %s42_s15, %s426_s24  ;;  %p432_p7 = scmp.lt.s32.totalorder %s426_s24, %s426_s24 }
  0x2d   :  { %p433_p8 = por %p432_p7, %p431_p6 }
  0x2f   :  { %p434_p9 = pnand %p433_p8, %p427_p5 }
  0x31   :  { %437 = shalt.err (!%p434_p9)
}
  0x32   :  { %47 = dma.hbm_to_vmem [thread:$0]  %s570_s2, 1024, %s42_s15, [#allocation7], %s468_s27, %s468_s27, %s469_s28  }
  0x33   :  { %460 = dma.done.wait [#allocation4], 128  }
  0x34   :  { %461 = vsyncadd [#allocation4], 4294967168 }
  0x35   :  { %462 = dma.done.wait [#allocation7], 1344  }
  0x36   :  { %463 = vsyncadd [#allocation7], 4294965952  ;;  %v471_v0 = vmov 0.0   ;;  %vm472_vm0 = vmmov 0   ;;  %v358_v1 = vld [vmem:[#allocation6] sm:$0xff]   ;;  %vm104_vm1 = vcmask 1040384  }
  0x37   :  { %318 = vmatprep.subr.bf16.mxu0 %v471_v0  ;;  %324 = vmatprep.mubr.msk.bf16.mxu0 %vm472_vm0, %v471_v0  ;;  %v359_v2 = vld [vmem:[#allocation6 + $0x8] sm:$0xff]   ;;  %v360_v3 = vld [vmem:[#allocation6 + $0x10] ss:$0 sps:$4 sm:$0x11]   ;;  %v362_v4 = vld [vmem:[#allocation8] sm:$0xff]   ;;  %vm100_vm2 = vcmask 277504  }
  0x38   :  { %328 = vmatprep.subr.bf16.mxu1 %v471_v0  ;;  %344 = vmatprep.mubr.msk.bf16.mxu1 %vm472_vm0, %v471_v0  ;;  %v106_v5 = vsel %vm104_vm1, %v360_v3, 0  ;;  %v363_v6 = vld [vmem:[#allocation8 + $0x8] sm:$0xff]   ;;  %v364_v8 = vld [vmem:[#allocation8 + $0x10] sm:$0xff]   ;;  %v365_v9 = vld [vmem:[#allocation8 + $0x18] sm:$0xff]   ;;  %s473_s26 = smov [#allocation9]  }
  0x39   :  { %319 = vmatpush3.bf16.msra.mxu0 %v358_v1  ;;  %329 = vmatpush3.bf16.msra.mxu1 %v362_v4  ;;  %v361_v7 = vld [vmem:[#allocation3] sm:$0xff]   ;;  %v368_v12 = vld [vmem:[#allocation8 + $0x30] sm:$0xff]   ;;  %v369_v13 = vld [vmem:[#allocation8 + $0x38] sm:$0xff]   ;;  %s278_s27 = sshll.u32 %s473_s26, 4  ;;  %s279_s27 = int_to_ptr.vmem [resolvable:$true] %s278_s27 }
  0x3a   :  { %320 = vmatprep.subr.bf16.mxu0 %v471_v0  ;;  %330 = vmatprep.subr.bf16.mxu1 %v471_v0  ;;  %v366_v10 = vld [vmem:[#allocation8 + $0x20] sm:$0xff]   ;;  %v367_v11 = vld [vmem:[#allocation8 + $0x28] sm:$0xff]   ;;  %s438_s28 = scalar_lea.vmem %s279_s27, 256  ;;  %p443_p11 = scmp.lt.s32.totalorder %s279_s27, %s279_s27 }
  0x3b   :  { %v291_v23 = vld [vmem:[%s571_s3] ss:$0 sm:$0xff]  ;;  %p439_p10 = scmp.ne.s32.totalorder %s279_s27, %s438_s28  ;;  %p444_p12 = scmp.lt.s32.totalorder %s438_s28, %s438_s28 }
  0x3d   :  { %321 = vmatpush3.bf16.msra.mxu0 %v359_v2  ;;  %331 = vmatpush3.bf16.msra.mxu1 %v363_v6  ;;  %p445_p13 = por %p444_p12, %p443_p11 }
  0x3e   :  { %322 = vmatprep.subr.bf16.mxu0 %v471_v0  ;;  %332 = vmatprep.subr.bf16.mxu1 %v471_v0 }
  0x3f   :  { %p446_p0 = pnand %p445_p13, %p439_p10 }
  0x41   :  { %323 = vmatpush3.bf16.msra.mxu0 %v106_v5  ;;  %333 = vmatpush3.bf16.msra.mxu1 %v364_v8 }
  0x42   :  { %334 = vmatprep.subr.bf16.mxu1 %v471_v0 }
  0x44   :  { %325 = vmatmul.mubr.msk.bf16.vlgmr.msra.gmra.mrb[0].mxu0 %vm100_vm2, %v361_v7 }
  0x45   :  { %335 = vmatpush3.bf16.msra.mxu1 %v365_v9 }
  0x46   :  { %336 = vmatprep.subr.bf16.mxu1 %v471_v0 }
  0x49   :  { %337 = vmatpush3.bf16.msra.mxu1 %v366_v10 }
  0x4a   :  { %338 = vmatprep.subr.bf16.mxu1 %v471_v0 }
  0x4d   :  { %339 = vmatpush3.bf16.msra.mxu1 %v367_v11 }
  0x4e   :  { %340 = vmatprep.subr.bf16.mxu1 %v471_v0 }
  0x51   :  { %341 = vmatpush3.bf16.msra.mxu1 %v368_v12 }
  0x52   :  { %342 = vmatprep.subr.bf16.mxu1 %v471_v0 }
  0x55   :  { %343 = vmatpush3.bf16.msra.mxu1 %v369_v13 }
 0x117   :  { %v142_v14 = vpop.f32.mrb[0].mxu0 }
 0x118   :  { %v326_v15 = vpop.f32.mrb[1].mxu0  ;;  %v149_v17 = vmin.f32 %v142_v14, 0.0 }
 0x119   :  { %v145_v16 = vpop.f32.mrb[2].mxu0 }
 0x11a   :  { %v150_v18 = vmin.f32 %v145_v16, 0.0  ;;  %v327_v19 = vpop.f32.mrb[3].mxu0 }
 0x11c   :  { %v151_v20 = vpack.c.bf16 %v150_v18, %v149_v17 }
 0x11e   :  { %v153_v21 = vmul.bf16 1069105081, %v151_v20 }
 0x120   :  { %370 = vpow.bf16 %v153_v21 }
 0x12b   :  { %v371_v22 = vpop.eup %370 }
 0x12c   :  { %345 = vmatmul.mubr.bf16.vlgmr.msra.gmra.mrb[0].mxu1 %v371_v22 }
 0x1ff   :  { %v255_v24 = vpop.f32.mrb[0].mxu1 }
 0x200   :  { %v262_v25 = vadd.f32 %v291_v23, %v255_v24  ;;  %v346_v26 = vpop.f32.mrb[1].mxu1 }
 0x201   :  { %v258_v27 = vpop.f32.mrb[2].mxu1 }
 0x202   :  { %271 = vst [vmem:[#allocation9] sm:$0xff] %v262_v25  ;;  %v263_v28 = vadd.f32 %v291_v23, %v258_v27  ;;  %v347_v29 = vpop.f32.mrb[3].mxu1 }
 0x204   :  { %272 = vst [vmem:[#allocation9 + $0x8] sm:$0xff] %v263_v28 }
 0x205   :  { %449 = shalt.err (!%p446_p0)
}
 0x206   :  { %s450_s30 = scalar_lea.hbm %s572_s4, 256 }
 0x207   :  { %p451_p1 = scmp.ne.s32.totalorder %s572_s4, %s450_s30  ;;  %p454_p2 = scmp.lt.u32.totalorder %s450_s30, %s572_s4 }
 0x209   :  { %p456_p3 = pnand %p454_p2, %p451_p1 }
 0x20b   :  { %459 = shalt.err (!%p456_p3)
}
 0x20c   :  { %s474_s9 = smov 128   ;;  %s475_s10 = smov 8  }
 0x20d   :  { %284 = dma.vmem_to_hbm [thread:$0]  %s279_s27, 256, %s572_s4, [#allocation5], %s474_s9, %s474_s9, %s475_s10  }
 0x20e   :  { %464 = dma.done.wait [#allocation5], 256  }
 0x20f   :  { %465 = vsyncadd [#allocation5], 4294967040 }
 0x210   :  { %288 = vsyncpa [#allocation4], 1 }
 0x211   :  { %289 = vsyncpa [#allocation7], 1 }
 0x212   :  { %290 = vsyncpa [#allocation5], 1 }

</bundles_post_ra>
